<compile_context>
chip_gen: v7x
topology: tpu7x:2x2x1
jax: 0.10.0
libtpu: 0.0.40
codegen_flags: <defaults>
</compile_context>

<pallas_src>
import jax
import jax.numpy as jnp
from jax.experimental import pallas as pl
from jax.experimental.pallas import tpu as pltpu


def _rsub_kernel(x_ref, y_ref, o_ref):
    # torch.rsub(x, y) = y - x
    o_ref[...] = y_ref[...] - x_ref[...]


_LANE = 128
# ~1 MiB per operand per block: big enough to sit near the HBM roofline,
# small enough that 3 operands x 2 pipeline buffers stays well under the
# default scoped VMEM limit on every generation (v5e 16 MiB, v6e/v7x 32 MiB).
_TARGET_BLOCK_BYTES = 1 << 20
# Small-input fast path threshold: 3 * n * itemsize below this -> single block.
_SMALL_TOTAL_BYTES = 2 << 20


def _sublane_pack(dtype):
    # sublane packing multiple: 8 for 4-byte, 16 for 2-byte, 32 for 1-byte
    itemsize = jnp.dtype(dtype).itemsize
    return max(8, 32 // itemsize)


def rsub(x, y):
    """torch.rsub(x, y) == y - x, elementwise, via Pallas TPU kernels."""
    assert x.shape == y.shape, "same-shape inputs expected (no broadcasting)"
    assert x.dtype == y.dtype
    orig_shape = x.shape
    dtype = x.dtype
    itemsize = jnp.dtype(dtype).itemsize
    n = x.size

    if n == 0:
        return jnp.zeros(orig_shape, dtype)

    # ---------- small-input fast path: one block, no grid, no copies ----------
    if 3 * n * itemsize <= _SMALL_TOTAL_BYTES:
        if n % _LANE == 0:
            shp = (n // _LANE, _LANE)   # lane-dense 2D slab
        else:
            shp = (1, n)                # block == full array dims: always legal
        out = pl.pallas_call(
            _rsub_kernel,
            out_shape=jax.ShapeDtypeStruct(shp, dtype),
        )(x.reshape(shp), y.reshape(shp))
        return out.reshape(orig_shape)

    # ---------- large-input path: wide lane-dense slab + 1-D grid ----------
    # Pick the widest lane dimension (multiple of 128) that divides n so we
    # can reshape without materializing padded copies of x and y in HBM.
    width = None
    for w in (8192, 4096, 2048, 1024, 512, 256, 128):
        if n % w == 0:
            width = w
            break

    if width is None:
        # Ragged flat size: pad only up to the next multiple of 128 lanes.
        # TODO(synk): handle the ragged tail with a masked store instead of
        # materializing padded copies of both inputs.
        width = _LANE
        n_pad = ((n + _LANE - 1) // _LANE) * _LANE
        xf = jnp.pad(x.reshape(-1), (0, n_pad - n)).reshape(-1, width)
        yf = jnp.pad(y.reshape(-1), (0, n_pad - n)).reshape(-1, width)
    else:
        xf = x.reshape(-1, width)
        yf = y.reshape(-1, width)

    rows = xf.shape[0]
    pack = _sublane_pack(dtype)
    # ~_TARGET_BLOCK_BYTES per operand, rounded down to the sublane packing.
    block_rows = max(pack, (_TARGET_BLOCK_BYTES // (width * itemsize)) // pack * pack)
    if block_rows >= rows:
        block_rows = rows  # single row-block; full-dim block is always legal

    grid = (pl.cdiv(rows, block_rows),)

    out = pl.pallas_call(
        _rsub_kernel,
        out_shape=jax.ShapeDtypeStruct((rows, width), dtype),
        grid=grid,
        in_specs=[
            pl.BlockSpec((block_rows, width), lambda i: (i, 0)),
            pl.BlockSpec((block_rows, width), lambda i: (i, 0)),
        ],
        out_specs=pl.BlockSpec((block_rows, width), lambda i: (i, 0)),
        compiler_params=pltpu.CompilerParams(
            dimension_semantics=("parallel",),
        ),
    )(xf, yf)

    if out.size != n:
        out = out.reshape(-1)[:n]
    return out.reshape(orig_shape)


if __name__ == "__main__":
    key = jax.random.PRNGKey(0)
    kx, ky = jax.random.split(key)

    # Small shape consistent with the module's test usage (NCHW-like).
    shape = (2, 4, 16, 16)
    x = jax.random.normal(kx, shape, dtype=jnp.float32)
    y = jax.random.normal(ky, shape, dtype=jnp.float32)

    out = rsub(x, y)
    out = jax.block_until_ready(out)
    ref = y - x  # torch.rsub(x, y) semantics
    assert out.shape == ref.shape
    assert jnp.allclose(out, ref, atol=1e-6), "small-path mismatch vs reference"

    # Also exercise the gridded large-input path once.
    shape_big = (8, 64, 64, 64)
    xb = jax.random.normal(kx, shape_big, dtype=jnp.float32)
    yb = jax.random.normal(ky, shape_big, dtype=jnp.float32)
    out_b = jax.block_until_ready(rsub(xb, yb))
    assert jnp.allclose(out_b, yb - xb, atol=1e-6), "large-path mismatch vs reference"

    print("KERNEL_OK")
</pallas_src>

<mosaic_0001>
module attributes {stable_mosaic.version = 11 : i64} {
  func.func @_rsub_kernel(%arg0: memref<16x128xf32, #tpu.memory_space<vmem>>, %arg1: memref<16x128xf32, #tpu.memory_space<vmem>>, %arg2: memref<16x128xf32, #tpu.memory_space<vmem>>) attributes {dimension_semantics = [], scalar_prefetch = 0 : i64, scratch_operands = 0 : i64, tpu.core_type = #tpu.core_type<tc>} {
    %c0 = arith.constant 0 : index
    %c0_0 = arith.constant 0 : index
    %0 = vector.load %arg1[%c0, %c0_0] : memref<16x128xf32, #tpu.memory_space<vmem>>, vector<16x128xf32>
    %c0_1 = arith.constant 0 : index
    %c0_2 = arith.constant 0 : index
    %1 = vector.load %arg0[%c0_1, %c0_2] : memref<16x128xf32, #tpu.memory_space<vmem>>, vector<16x128xf32>
    %2 = arith.subf %0, %1 : vector<16x128xf32>
    %c0_3 = arith.constant 0 : index
    %c0_4 = arith.constant 0 : index
    %3 = vector.load %arg2[%c0_3, %c0_4] : memref<16x128xf32, #tpu.memory_space<vmem>>, vector<16x128xf32>
    tpu.vector_store %arg2[%c0_3, %c0_4], %2 {strides = array<i32>} : memref<16x128xf32, #tpu.memory_space<vmem>>, vector<16x128xf32>,
    return
  }
}

</mosaic_0001>

<bundles_post_ra>
// kernel: tpu_custom_call.1
= control target key start
LH: loop header
LB: loop body
LE: loop exit
PB: predicated region body
PF: predicated region fallthrough
CT: control target
= control target key end

     0   :  { %7 = vsyncpa [#allocation3], 0  ;;  %s208_s0 = inlined_call_operand.hbm [shape: f32[16,128], index: 0, kind: input, shape index: {}]   ;;  %s209_s1 = inlined_call_operand.hbm [shape: f32[16,128], index: 1, kind: input, shape index: {}]   ;;  %s210_s2 = inlined_call_operand.hbm [shape: f32[16,128], index: 2, kind: output, shape index: {}]  }
   0x1   :  { %8 = vsyncpa [#allocation6], 0 }
   0x2   :  { %9 = vsyncpa [#allocation4], 0  ;;  %s143_s9 = smov [#allocation2]   ;;  %s71_s13 = scalar_lea.hbm %s208_s0, 256 }
   0x3   :  { %s15_s10 = sshll.u32 %s143_s9, 4  ;;  %p72_p0 = scmp.ne.s32.totalorder %s208_s0, %s71_s13  ;;  %s16_s10 = int_to_ptr.vmem [resolvable:$true] %s15_s10 }
   0x4   :  { %p75_p1 = scmp.lt.u32.totalorder %s71_s13, %s208_s0 }
   0x6   :  { %p77_p2 = pnand %p75_p1, %p72_p0 }
   0x8   :  { %80 = shalt.err (!%p77_p2)
}
   0x9   :  { %s81_s18 = scalar_lea.vmem %s16_s10, 256  ;;  %p86_p4 = scmp.lt.s32.totalorder %s16_s10, %s16_s10 }
   0xa   :  { %p82_p3 = scmp.ne.s32.totalorder %s16_s10, %s81_s18  ;;  %p87_p5 = scmp.lt.s32.totalorder %s81_s18, %s81_s18 }
   0xc   :  { %p88_p6 = por %p87_p5, %p86_p4 }
   0xe   :  { %p89_p7 = pnand %p88_p6, %p82_p3 }
  0x10   :  { %92 = shalt.err (!%p89_p7)
}
  0x11   :  { %s144_s19 = smov 128   ;;  %s145_s20 = smov 8  }
  0x12   :  { %21 = dma.hbm_to_vmem [thread:$0]  %s208_s0, 256, %s16_s10, [#allocation3], %s144_s19, %s144_s19, %s145_s20  }
  0x13   :  { %s146_s23 = smov [#allocation5]   ;;  %s93_s27 = scalar_lea.hbm %s209_s1, 256 }
  0x14   :  { %s27_s24 = sshll.u32 %s146_s23, 4  ;;  %p94_p8 = scmp.ne.s32.totalorder %s209_s1, %s93_s27  ;;  %s28_s24 = int_to_ptr.vmem [resolvable:$true] %s27_s24 }
  0x15   :  { %p97_p9 = scmp.lt.u32.totalorder %s93_s27, %s209_s1 }
  0x17   :  { %p99_p10 = pnand %p97_p9, %p94_p8 }
  0x19   :  { %102 = shalt.err (!%p99_p10)
}
  0x1a   :  { %s103_s4 = scalar_lea.vmem %s28_s24, 256  ;;  %p108_p12 = scmp.lt.s32.totalorder %s28_s24, %s28_s24 }
  0x1b   :  { %p104_p11 = scmp.ne.s32.totalorder %s28_s24, %s103_s4  ;;  %p109_p13 = scmp.lt.s32.totalorder %s103_s4, %s103_s4 }
  0x1d   :  { %p110_p0 = por %p109_p13, %p108_p12 }
  0x1f   :  { %p111_p1 = pnand %p110_p0, %p104_p11 }
  0x21   :  { %114 = shalt.err (!%p111_p1)
}
  0x22   :  { %33 = dma.hbm_to_vmem [thread:$0]  %s209_s1, 256, %s28_s24, [#allocation6], %s144_s19, %s144_s19, %s145_s20  }
  0x23   :  { %137 = dma.done.wait [#allocation3], 256  }
  0x24   :  { %138 = vsyncadd [#allocation3], 4294967040 }
  0x25   :  { %139 = dma.done.wait [#allocation6], 256  }
  0x26   :  { %140 = vsyncadd [#allocation6], 4294967040  ;;  %s147_s6 = smov [#allocation7]   ;;  %v40_v0 = vld [vmem:[#allocation5] sm:$0xff]  ;;  %v42_v1 = vld [vmem:[#allocation2] sm:$0xff] }
  0x27   :  { %s53_s7 = sshll.u32 %s147_s6, 4  ;;  %v41_v2 = vld [vmem:[#allocation5 + $0x8] sm:$0xff]  ;;  %v44_v3 = vsub.f32 %v40_v0, %v42_v1  ;;  %v43_v4 = vld [vmem:[#allocation2 + $0x8] sm:$0xff]  ;;  %s54_s7 = int_to_ptr.vmem [resolvable:$true] %s53_s7 }
  0x28   :  { %v45_v5 = vsub.f32 %v41_v2, %v43_v4  ;;  %s115_s8 = scalar_lea.vmem %s54_s7, 256  ;;  %p120_p3 = scmp.lt.s32.totalorder %s54_s7, %s54_s7 }
  0x29   :  { %46 = vst [vmem:[#allocation7] sm:$0xff] %v44_v3  ;;  %p116_p2 = scmp.ne.s32.totalorder %s54_s7, %s115_s8  ;;  %p121_p4 = scmp.lt.s32.totalorder %s115_s8, %s115_s8 }
  0x2a   :  { %47 = vst [vmem:[#allocation7 + $0x8] sm:$0xff] %v45_v5 }
  0x2b   :  { %p122_p5 = por %p121_p4, %p120_p3 }
  0x2d   :  { %p123_p6 = pnand %p122_p5, %p116_p2 }
  0x2f   :  { %126 = shalt.err (!%p123_p6)
}
  0x30   :  { %s127_s10 = scalar_lea.hbm %s210_s2, 256 }
  0x31   :  { %p128_p7 = scmp.ne.s32.totalorder %s210_s2, %s127_s10  ;;  %p131_p8 = scmp.lt.u32.totalorder %s127_s10, %s210_s2 }
  0x33   :  { %p133_p9 = pnand %p131_p8, %p128_p7 }
  0x35   :  { %136 = shalt.err (!%p133_p9)
}
  0x36   :  { %59 = dma.vmem_to_hbm [thread:$0]  %s54_s7, 256, %s210_s2, [#allocation4], %s144_s19, %s144_s19, %s145_s20  }
  0x37   :  { %141 = dma.done.wait [#allocation4], 256  }
  0x38   :  { %142 = vsyncadd [#allocation4], 4294967040 }
  0x39   :  { %63 = vsyncpa [#allocation3], 1 }
  0x3a   :  { %64 = vsyncpa [#allocation6], 1 }
  0x3b   :  { %65 = vsyncpa [#allocation4], 1 }

</bundles_post_ra>
